<compile_context>
chip_gen: v5e
topology: v5e:2x2
jax: 0.10.0
libtpu: 0.0.40
codegen_flags: <defaults>
</compile_context>

<pallas_src>
import math

import jax
import jax.numpy as jnp
from jax.experimental import pallas as pl
from jax.experimental.pallas import tpu as pltpu

LOGSNR_MIN = -15.0
LOGSNR_MAX = 15.0
T_MIN = math.atan(math.exp(-0.5 * LOGSNR_MAX))
T_MAX = math.atan(math.exp(-0.5 * LOGSNR_MIN))
MIN_SNR_GAMMA = 5.0


def logsnr_schedule_cosine(t):
    # per-batch scalars; plain-JAX glue, matches the PyTorch schedule exactly
    arg = T_MIN + t * (T_MAX - T_MIN)
    return -2.0 * jnp.log(jnp.maximum(jnp.tan(arg), 1e-20))


def _diffusion_loss_kernel(coef_ref, w_ref, tvec_ref, img_ref, noise_ref, out_ref):
    """One lane tile of the fused diffusion loss.

    coef_ref  : SMEM (8, G) f32, per-tile fused coefficients:
                  row 0: 2*alpha        (x  += c0*img)
                  row 1: sigma          (x  += c1*eps)
                  row 2: -alpha         (x  += c2)
                  row 3: log_snr        (model bias multiplier for t_vec)
                  row 4: alpha          (diff -= c4*eps)
                  row 5: 2*sigma        (diff += c5*img)
                  row 6: sigma          (diff -= c6)
                  row 7: min_snr_weight / (B*C*HW)   (weighted-mean scale)
    w_ref     : VMEM (C, C)  synthetic denoiser 1x1-conv channel-mix weight
    tvec_ref  : VMEM (C, 1)  synthetic denoiser log-SNR modulation vector
    img_ref   : VMEM (C, TW) bf16 raw image tile in [0, 1]
    noise_ref : VMEM (C, TW) bf16 gaussian noise tile
    out_ref   : VMEM (C, 128) f32 lane-folded weighted squared-error partials
    """
    i = pl.program_id(0)

    # per-tile (== per-batch) scalars, precomputed in glue, read from SMEM
    c0 = coef_ref[0, i]
    c1 = coef_ref[1, i]
    c2 = coef_ref[2, i]
    c3 = coef_ref[3, i]
    c4 = coef_ref[4, i]
    c5 = coef_ref[5, i]
    c6 = coef_ref[6, i]
    c7 = coef_ref[7, i]

    img = img_ref[...].astype(jnp.float32)    # (C, TW)
    eps = noise_ref[...].astype(jnp.float32)  # (C, TW)

    # normalize_to_neg_one_to_one + q_sample fused:
    #   x = alpha*(2*img - 1) + sigma*eps = c0*img + c1*eps + c2
    x = c0 * img + c1 * eps + c2

    # synthetic denoiser channel mix on the VPU (no MXU):
    #   mixed[o, :] = sum_c W[o, c] * x[c, :]
    C = x.shape[0]
    mixed = w_ref[:, 0:1] * x[0:1, :]
    for c in range(1, C):
        mixed = mixed + w_ref[:, c:c + 1] * x[c:c + 1, :]

    # per-channel log-SNR modulation
    model_out = mixed + tvec_ref[...] * c3

    # 'v' objective: target = alpha*eps - sigma*(2*img - 1)
    #   diff = model_out - target = model_out - c4*eps + c5*img - c6
    diff = model_out - c4 * eps + c5 * img - c6

    # min-SNR weighted squared error, pre-scaled so the glue-side sum is the mean
    wsq = diff * diff * c7                    # (C, TW)

    # lane-dense partial: fold 128-lane chunks (static slices at vreg boundaries)
    tw = wsq.shape[1]
    part = wsq[:, 0:128]
    for k in range(1, tw // 128):
        part = part + wsq[:, k * 128:(k + 1) * 128]
    out_ref[...] = part                       # (C, 128)


def gaussian_diffusion_forward(img, times, noise, w_mix, t_vec,
                               *, transport_dtype=jnp.bfloat16,
                               max_tile_lanes=4096):
    """img: (B, C, H, W) in [0, 1]; times: (B,); noise: (B, C, H, W)."""
    B, C, H, W = img.shape
    HW = H * W
    N = B * HW
    # TODO(synk): pad the spatial axis per batch if H*W is not a multiple of 128.
    assert HW % 128 == 0, "spatial extent H*W must be a multiple of 128"

    # lane tile: multiple of 128, divides HW so a tile never straddles a batch;
    # at realistic sizes keep it >=512 (and raise vmem_limit_bytes accordingly).
    tw = min(HW, max_tile_lanes)
    tw -= tw % 128
    while HW % tw:
        tw -= 128
    tiles_per_batch = HW // tw
    num_tiles = N // tw

    # (B, C, H, W) -> (C, B*HW): channels on sublanes, batch*spatial on lanes.
    # bf16 on the wire (mem-bound at real sizes); compute is f32 inside the kernel.
    img2 = jnp.transpose(img.reshape(B, C, HW), (1, 0, 2)).reshape(C, N)
    noise2 = jnp.transpose(noise.reshape(B, C, HW), (1, 0, 2)).reshape(C, N)
    img2 = img2.astype(transport_dtype)
    noise2 = noise2.astype(transport_dtype)

    # per-batch schedule scalars, hoisted out of the kernel
    ls = logsnr_schedule_cosine(times.astype(jnp.float32))       # (B,)
    alpha = jnp.sqrt(jax.nn.sigmoid(ls))
    sigma = jnp.sqrt(jax.nn.sigmoid(-ls))
    snr = jnp.exp(ls)
    weight = jnp.minimum(snr, MIN_SNR_GAMMA) / (snr + 1.0)       # 'v' objective
    wcoef = weight / float(C * HW * B)                           # folds both means

    coef_b = jnp.stack(
        [2.0 * alpha, sigma, -alpha, ls, alpha, 2.0 * sigma, sigma, wcoef],
        axis=0).astype(jnp.float32)                              # (8, B)
    # one column per grid tile (lanes are batch-major, so repeat per batch)
    coef_tile = jnp.repeat(coef_b, tiles_per_batch, axis=1)      # (8, num_tiles)

    w32 = w_mix.astype(jnp.float32)
    tvec2 = t_vec.reshape(C, 1).astype(jnp.float32)

    partials = pl.pallas_call(
        _diffusion_loss_kernel,
        out_shape=jax.ShapeDtypeStruct((C, num_tiles * 128), jnp.float32),
        grid=(num_tiles,),
        in_specs=[
            pl.BlockSpec(memory_space=pltpu.MemorySpace.SMEM),    # coef table
            pl.BlockSpec((C, C), lambda i: (0, 0)),               # channel-mix W
            pl.BlockSpec((C, 1), lambda i: (0, 0)),               # t-vector
            pl.BlockSpec((C, tw), lambda i: (0, i)),              # img tile
            pl.BlockSpec((C, tw), lambda i: (0, i)),              # noise tile
        ],
        out_specs=pl.BlockSpec((C, 128), lambda i: (0, i)),       # lane-dense partials
        compiler_params=pltpu.CompilerParams(
            dimension_semantics=("parallel",),   # tiles are independent (megacore)
            vmem_limit_bytes=32 * 1024 * 1024,
        ),
    )(coef_tile, w32, tvec2, img2, noise2)

    # tiny finalize in glue: coefficients already include min-SNR weight and means
    return jnp.sum(partials)


def _reference_forward(img, times, noise, w_mix, t_vec):
    # pure-JAX (f32) reference of the same semantics, for a sanity check
    B, C, H, W = img.shape
    x0 = img.reshape(B, C, H * W) * 2.0 - 1.0
    eps = noise.reshape(B, C, H * W)
    ls = logsnr_schedule_cosine(times).reshape(B, 1, 1)
    alpha = jnp.sqrt(jax.nn.sigmoid(ls))
    sigma = jnp.sqrt(jax.nn.sigmoid(-ls))
    x = x0 * alpha + eps * sigma
    mixed = jnp.einsum("oc,bcn->bon", w_mix, x)
    model_out = mixed + t_vec.reshape(1, C, 1) * ls
    target = alpha * eps - sigma * x0
    loss = jnp.mean((model_out - target) ** 2, axis=(1, 2))
    snr = jnp.exp(ls.reshape(B))
    weight = jnp.minimum(snr, MIN_SNR_GAMMA) / (snr + 1.0)
    return jnp.mean(loss * weight)


if __name__ == "__main__":
    B, C, H, W = 2, 4, 16, 16

    key = jax.random.PRNGKey(0)
    k_img, k_t, k_noise, k_w, k_tv = jax.random.split(key, 5)

    # forward() draws `times` ~ U(0,1) and `noise` ~ N(0,1) internally in torch;
    # here they are drawn deterministically from PRNGKey(0) and passed in.
    img = jax.random.uniform(k_img, (B, C, H, W), dtype=jnp.float32)   # [0, 1]
    times = jax.random.uniform(k_t, (B,), dtype=jnp.float32)
    noise = jax.random.normal(k_noise, (B, C, H, W), dtype=jnp.float32)

    # deterministic synthetic denoiser parameters (stand-in for self.model)
    w_mix = 0.3 * jax.random.normal(k_w, (C, C), dtype=jnp.float32)
    t_vec = 0.1 * jax.random.normal(k_tv, (C,), dtype=jnp.float32)

    loss = gaussian_diffusion_forward(img, times, noise, w_mix, t_vec)
    loss = jax.block_until_ready(loss)

    ref = _reference_forward(img, times, noise, w_mix, t_vec)
    assert bool(jnp.isfinite(loss)), "non-finite loss"
    assert bool(jnp.allclose(loss, ref, rtol=5e-2, atol=1e-3)), (loss, ref)

    print("KERNEL_OK")
</pallas_src>

<mosaic_0001>
module attributes {stable_mosaic.version = 11 : i64} {
  func.func @_diffusion_loss_kernel(%arg0: i32, %arg1: memref<8x2xf32, #tpu.memory_space<smem>>, %arg2: memref<4x4xf32, #tpu.memory_space<vmem>>, %arg3: memref<4x1xf32, #tpu.memory_space<vmem>>, %arg4: memref<4x256xbf16, #tpu.memory_space<vmem>>, %arg5: memref<4x256xbf16, #tpu.memory_space<vmem>>, %arg6: memref<4x128xf32, #tpu.memory_space<vmem>>) attributes {dimension_semantics = [#tpu.dimension_semantics<parallel>], iteration_bounds = array<i64: 2>, scalar_prefetch = 0 : i64, scratch_operands = 0 : i64, tpu.core_type = #tpu.core_type<tc>, window_params = [{transform_indices = @transform_0, window_bounds = array<i64: 8, 2>}, {pipeline_mode = #tpu.pipeline_mode<synchronous>, transform_indices = @transform_1, window_bounds = array<i64: 4, 4>}, {pipeline_mode = #tpu.pipeline_mode<synchronous>, transform_indices = @transform_2, window_bounds = array<i64: 4, 1>}, {transform_indices = @transform_3, window_bounds = array<i64: 4, 256>}, {transform_indices = @transform_4, window_bounds = array<i64: 4, 256>}, {transform_indices = @transform_5, window_bounds = array<i64: 4, 128>}]} {
    %c0 = arith.constant 0 : index
    %0 = arith.index_cast %arg0 : i32 to index
    %1 = memref.load %arg1[%c0, %0] : memref<8x2xf32, #tpu.memory_space<smem>>
    %c1 = arith.constant 1 : index
    %2 = arith.index_cast %arg0 : i32 to index
    %3 = memref.load %arg1[%c1, %2] : memref<8x2xf32, #tpu.memory_space<smem>>
    %c2 = arith.constant 2 : index
    %4 = arith.index_cast %arg0 : i32 to index
    %5 = memref.load %arg1[%c2, %4] : memref<8x2xf32, #tpu.memory_space<smem>>
    %c3 = arith.constant 3 : index
    %6 = arith.index_cast %arg0 : i32 to index
    %7 = memref.load %arg1[%c3, %6] : memref<8x2xf32, #tpu.memory_space<smem>>
    %c4 = arith.constant 4 : index
    %8 = arith.index_cast %arg0 : i32 to index
    %9 = memref.load %arg1[%c4, %8] : memref<8x2xf32, #tpu.memory_space<smem>>
    %c5 = arith.constant 5 : index
    %10 = arith.index_cast %arg0 : i32 to index
    %11 = memref.load %arg1[%c5, %10] : memref<8x2xf32, #tpu.memory_space<smem>>
    %c6 = arith.constant 6 : index
    %12 = arith.index_cast %arg0 : i32 to index
    %13 = memref.load %arg1[%c6, %12] : memref<8x2xf32, #tpu.memory_space<smem>>
    %c7 = arith.constant 7 : index
    %14 = arith.index_cast %arg0 : i32 to index
    %15 = memref.load %arg1[%c7, %14] : memref<8x2xf32, #tpu.memory_space<smem>>
    %c0_0 = arith.constant 0 : index
    %c0_1 = arith.constant 0 : index
    %16 = vector.load %arg4[%c0_0, %c0_1] : memref<4x256xbf16, #tpu.memory_space<vmem>>, vector<4x256xbf16>
    %17 = arith.extf %16 : vector<4x256xbf16> to vector<4x256xf32>
    %c0_2 = arith.constant 0 : index
    %c0_3 = arith.constant 0 : index
    %18 = vector.load %arg5[%c0_2, %c0_3] : memref<4x256xbf16, #tpu.memory_space<vmem>>, vector<4x256xbf16>
    %19 = arith.extf %18 : vector<4x256xbf16> to vector<4x256xf32>
    %20 = vector.broadcast %1 : f32 to vector<4x256xf32>
    %21 = arith.mulf %20, %17 : vector<4x256xf32>
    %22 = vector.broadcast %3 : f32 to vector<4x256xf32>
    %23 = arith.mulf %22, %19 : vector<4x256xf32>
    %24 = arith.addf %21, %23 : vector<4x256xf32>
    %25 = vector.broadcast %5 : f32 to vector<4x256xf32>
    %26 = arith.addf %24, %25 : vector<4x256xf32>
    %c0_4 = arith.constant 0 : index
    %c0_5 = arith.constant 0 : index
    %27 = vector.load %arg2[%c0_4, %c0_5] : memref<4x4xf32, #tpu.memory_space<vmem>>, vector<4x1xf32>
    %28 = vector.extract_strided_slice %26 {offsets = [0, 0], sizes = [1, 256], strides = [1, 1]} : vector<4x256xf32> to vector<1x256xf32>
    %29 = vector.broadcast %27 : vector<4x1xf32> to vector<4x256xf32>
    %30 = vector.broadcast %28 : vector<1x256xf32> to vector<4x256xf32>
    %31 = arith.mulf %29, %30 : vector<4x256xf32>
    %c0_6 = arith.constant 0 : index
    %c1_7 = arith.constant 1 : index
    %32 = vector.load %arg2[%c0_6, %c1_7] : memref<4x4xf32, #tpu.memory_space<vmem>>, vector<4x1xf32>
    %33 = vector.extract_strided_slice %26 {offsets = [1, 0], sizes = [1, 256], strides = [1, 1]} : vector<4x256xf32> to vector<1x256xf32>
    %34 = vector.broadcast %32 : vector<4x1xf32> to vector<4x256xf32>
    %35 = vector.broadcast %33 : vector<1x256xf32> to vector<4x256xf32>
    %36 = arith.mulf %34, %35 : vector<4x256xf32>
    %37 = arith.addf %31, %36 : vector<4x256xf32>
    %c0_8 = arith.constant 0 : index
    %c2_9 = arith.constant 2 : index
    %38 = vector.load %arg2[%c0_8, %c2_9] : memref<4x4xf32, #tpu.memory_space<vmem>>, vector<4x1xf32>
    %39 = vector.extract_strided_slice %26 {offsets = [2, 0], sizes = [1, 256], strides = [1, 1]} : vector<4x256xf32> to vector<1x256xf32>
    %40 = vector.broadcast %38 : vector<4x1xf32> to vector<4x256xf32>
    %41 = vector.broadcast %39 : vector<1x256xf32> to vector<4x256xf32>
    %42 = arith.mulf %40, %41 : vector<4x256xf32>
    %43 = arith.addf %37, %42 : vector<4x256xf32>
    %c0_10 = arith.constant 0 : index
    %c3_11 = arith.constant 3 : index
    %44 = vector.load %arg2[%c0_10, %c3_11] : memref<4x4xf32, #tpu.memory_space<vmem>>, vector<4x1xf32>
    %45 = vector.extract_strided_slice %26 {offsets = [3, 0], sizes = [1, 256], strides = [1, 1]} : vector<4x256xf32> to vector<1x256xf32>
    %46 = vector.broadcast %44 : vector<4x1xf32> to vector<4x256xf32>
    %47 = vector.broadcast %45 : vector<1x256xf32> to vector<4x256xf32>
    %48 = arith.mulf %46, %47 : vector<4x256xf32>
    %49 = arith.addf %43, %48 : vector<4x256xf32>
    %c0_12 = arith.constant 0 : index
    %c0_13 = arith.constant 0 : index
    %50 = vector.load %arg3[%c0_12, %c0_13] : memref<4x1xf32, #tpu.memory_space<vmem>>, vector<4x1xf32>
    %51 = vector.broadcast %7 : f32 to vector<4x1xf32>
    %52 = arith.mulf %50, %51 : vector<4x1xf32>
    %53 = vector.broadcast %52 : vector<4x1xf32> to vector<4x256xf32>
    %54 = arith.addf %49, %53 : vector<4x256xf32>
    %55 = vector.broadcast %9 : f32 to vector<4x256xf32>
    %56 = arith.mulf %55, %19 : vector<4x256xf32>
    %57 = arith.subf %54, %56 : vector<4x256xf32>
    %58 = vector.broadcast %11 : f32 to vector<4x256xf32>
    %59 = arith.mulf %58, %17 : vector<4x256xf32>
    %60 = arith.addf %57, %59 : vector<4x256xf32>
    %61 = vector.broadcast %13 : f32 to vector<4x256xf32>
    %62 = arith.subf %60, %61 : vector<4x256xf32>
    %63 = arith.mulf %62, %62 : vector<4x256xf32>
    %64 = vector.broadcast %15 : f32 to vector<4x256xf32>
    %65 = arith.mulf %63, %64 : vector<4x256xf32>
    %66 = vector.extract_strided_slice %65 {offsets = [0, 0], sizes = [4, 128], strides = [1, 1]} : vector<4x256xf32> to vector<4x128xf32>
    %67 = vector.extract_strided_slice %65 {offsets = [0, 128], sizes = [4, 128], strides = [1, 1]} : vector<4x256xf32> to vector<4x128xf32>
    %68 = arith.addf %66, %67 : vector<4x128xf32>
    %c0_14 = arith.constant 0 : index
    %c0_15 = arith.constant 0 : index
    %69 = vector.load %arg6[%c0_14, %c0_15] : memref<4x128xf32, #tpu.memory_space<vmem>>, vector<4x128xf32>
    tpu.vector_store %arg6[%c0_14, %c0_15], %68 {strides = array<i32>} : memref<4x128xf32, #tpu.memory_space<vmem>>, vector<4x128xf32>,
    return
  }
  func.func @transform_0(%arg0: i32) -> (i32, i32) {
    %c0_i32 = arith.constant 0 : i32
    %c0_i32_0 = arith.constant 0 : i32
    %c0_i32_1 = arith.constant 0 : i32
    return %c0_i32, %c0_i32_0 : i32, i32
  }
  func.func @transform_1(%arg0: i32) -> (i32, i32) {
    %c0_i32 = arith.constant 0 : i32
    %c0_i32_0 = arith.constant 0 : i32
    %c0_i32_1 = arith.constant 0 : i32
    return %c0_i32, %c0_i32_0 : i32, i32
  }
  func.func @transform_2(%arg0: i32) -> (i32, i32) {
    %c0_i32 = arith.constant 0 : i32
    %c0_i32_0 = arith.constant 0 : i32
    %c0_i32_1 = arith.constant 0 : i32
    return %c0_i32, %c0_i32_0 : i32, i32
  }
  func.func @transform_3(%arg0: i32) -> (i32, i32) {
    %c0_i32 = arith.constant 0 : i32
    %c0_i32_0 = arith.constant 0 : i32
    return %c0_i32, %arg0 : i32, i32
  }
  func.func @transform_4(%arg0: i32) -> (i32, i32) {
    %c0_i32 = arith.constant 0 : i32
    %c0_i32_0 = arith.constant 0 : i32
    return %c0_i32, %arg0 : i32, i32
  }
  func.func @transform_5(%arg0: i32) -> (i32, i32) {
    %c0_i32 = arith.constant 0 : i32
    %c0_i32_0 = arith.constant 0 : i32
    return %c0_i32, %arg0 : i32, i32
  }
}

</mosaic_0001>

<bundles_post_ra>
// kernel: tpu_custom_call.1
= control target key start
LH: loop header
LB: loop body
LE: loop exit
PB: predicated region body
PF: predicated region fallthrough
CT: control target
= control target key end

     0   :  { %s971_s0 = inlined_call_operand.vmem [shape: f32[8,2], index: 0, kind: input, shape index: {}]   ;;  %s972_s1 = inlined_call_operand.vmem [shape: f32[4,4], index: 1, kind: input, shape index: {}]   ;;  %s973_s2 = inlined_call_operand.vmem [shape: f32[4,1], index: 2, kind: input, shape index: {}]   ;;  %s974_s3 = inlined_call_operand.vmem [shape: bf16[4,512], index: 3, kind: input, shape index: {}]   ;;  %s975_s4 = inlined_call_operand.hbm [shape: bf16[4,512], index: 4, kind: input, shape index: {}]   ;;  %s976_s5 = inlined_call_operand.hbm [shape: f32[4,256], index: 5, kind: output, shape index: {}]  }
   0x1   :  { %978 = sst [smem:[#allocation11_spill]] %s971_s0 }
   0x2   :  { %979 = sst [smem:[#allocation12_spill]] %s972_s1 }
   0x3   :  { %10 = vsyncpa [#allocation5], 0 }
   0x4   :  { %11 = vsyncpa [#allocation3], 0 }
   0x5   :  { %13 = vsyncpa [#allocation3 + $0x1], 0 }
   0x6   :  { %14 = vsyncpa [#allocation4], 0 }
   0x7   :  { %16 = vsyncpa [#allocation4 + $0x1], 0  ;;  %s789_s18 = smov 0   ;;  %s791_s19 = smov 0  }
   0x8   :  { %s793_s20 = smov 0   ;;  %s795_s21 = smov 0  }
   0x9 LB: > { %s810_s22 = sadd.s32 4294967295, %s752_s21   ;;  %s531_s23 = sadd.s32 4294967294, %s752_s21   ;;  %s752_s21 = sphi %s795_s21, %s992_s21   ;;  %s748_s20 = sphi %s793_s20, %s991_s20   ;;  %s744_s19 = sphi %s791_s19, %s990_s19   ;;  %s740_s18 = sphi %s789_s18, %s989_s18  }
   0xa   : > { %p131_p0 = scmp.ne.s32.totalorder %s744_s19, %s740_s18  ;;  %p132_p1 = scmp.eq.s32.totalorder %s810_s22, 0 }
   0xb   : > { %p155_p2 = scmp.eq.s32.totalorder %s810_s22, 1  ;;  %p161_p3 = scmp.eq.s32.totalorder %s531_s23, 1 }
   0xc   : > { %p819_p4 = por %p132_p1, %p131_p0  ;;  %p532_p5 = scmp.ge.s32.totalorder %s752_s21, 1 }
   0xd   : > { %p824_p6 = por %p161_p3, %p131_p0  ;;  %p168_p7 = scmp.lt.s32.totalorder %s752_s21, 3 }
   0xe   : > { %s982_s0 = sld [smem:[#allocation11_spill]]  ;;  %s840_s30 = sadd.s32 1, %s752_s21  }
   0xf   : > { %p832_p8 = pnand %p532_p5, %p168_p7  ;;  %s115_s6 = ssub.s32 %s752_s21, %s840_s30 }
  0x10   : > { %p116_p12 = scmp.eq.s32.totalorder %s115_s6, 0  ;;  %s118_s7 = sadd.s32 1, %s748_s20 }
  0x11   : > { %p578_p10 = pneg %p832_p8  ;;  %p125_p13 = scmp.ne.s32.totalorder %s748_s20, %s744_s19 }
  0x12   : > { %s754_s8 = smov [#allocation2]   ;;  %p126_p0 = scmp.eq.s32.totalorder %s752_s21, 0 }
  0x13   : > { %p579_p11 = pnand %p578_p10, %p132_p1  ;;  %p855_p3 = por %p155_p2, %p125_p13 }
  0x14   : > { %s180_s28 = sshll.u32 %s982_s0, 4  ;;  %s206_s11 = sand.u32 1, %s748_s20   ;;  %s181_s28 = int_to_ptr.vmem [resolvable:$true] %s180_s28 }
  0x15   : > { %581 = dma.vmem_to_smem (!%p579_p11), %s181_s28, 128, %s754_s8, [#allocation5]  }
  0x16   : > { %s850_s9 = scalar_select %p116_p12, %s748_s20, %s118_s7  }
  0x17   : > { %p127_p5 = por %p126_p0, %p125_p13  ;;  %p591_p7 = scmp.lt.s32.totalorder %s752_s21, 2 }
  0x18   : > { %s535_s12 = sshll.u32 %s206_s11, 2  ;;  %s555_s13 = sshll.u32 %s752_s21, 2 }
  0x19   : > { %s215_s16 = scalar_lea.hbm %s975_s4, %s555_s13  ;;  %s210_s23 = scalar_lea.vmem [#allocation6], %s535_s12 }
  0x1a   : > { %s217_s17 = sshll.u32 %s215_s16, 4  ;;  %s219_s26 = sshll.u32 %s210_s23, 4  ;;  %s218_s17 = int_to_ptr.hbm [resolvable:$true] %s217_s17  ;;  %s220_s26 = int_to_ptr.vmem [resolvable:$true] %s219_s26 }
  0x1b   : > { %p865_p10 = pnand %p591_p7, %p127_p5  ;;  %s207_s28 = scalar_lea.sflag [#allocation3], %s206_s11 }
  0x1c   : > { %s652_s6 = sshra.s32 %s218_s17, 4  ;;  %s659_s12 = scalar_lea.hbm %s975_s4, 8  ;;  %s653_s6 = int_to_ptr.hbm [resolvable:$true] %s652_s6 }
  0x1d   : > { %s654_s7 = scalar_lea.hbm %s653_s6, 4  ;;  %p656_p11 = pneg %p865_p10 }
  0x1e   : > { %p655_p2 = scmp.ne.s32.totalorder %s653_s6, %s654_s7  ;;  %p660_p0 = scmp.lt.s32.totalorder %s653_s6, %s975_s4 }
  0x1f   : > { %p661_p5 = scmp.lt.s32.totalorder %s659_s12, %s654_s7 }
  0x20   : > { %p657_p12 = pnand %p656_p11, %p655_p2 }
  0x21   : > { %p662_p7 = por %p661_p5, %p660_p0 }
  0x22   : > { %p658_p13 = pneg %p657_p12 }
  0x24   : > { %p663_p9 = pnand %p662_p7, %p658_p13 }
  0x26   : > { %666 = shalt.err (!%p663_p9)
}
  0x27   : > { %585 = dma.hbm_to_vmem [thread:$0]  (!%p865_p10), %s218_s17, 64, %s220_s26, %s207_s28  }
  0x28   : > { %228 = sbr.rel (%p832_p8) target bundleno = 208 (0xd0), region = 40 }
  0x2d   : > { %727 = dma.done.wait (%p132_p1), [#allocation5], 128  }
  0x2e   : > { %729 = vsyncadd (%p132_p1), [#allocation5], 4294967168  ;;  %s886_s11 = sand.u32 1, %s744_s19  }
  0x2f   : > { %s977_s16 = sshll.u32 %s886_s11, 2  ;;  %s236_s23 = scalar_lea.sflag [#allocation3], %s886_s11 }
  0x30   : > { %s239_s17 = scalar_lea.vmem [#allocation6], %s977_s16 }
  0x31   : > { %731 = dma.done.wait (%p819_p4), %s236_s23, 64  }
  0x32   : > { %733 = vsyncadd (%p819_p4), %s236_s23, 4294967232 }
  0x33   : > { %245 = sfence }
  0x34   : > { %s986_s1 = sld [smem:[#allocation12_spill]]  ;;  %v755_v1 = vmov 0   ;;  %v756_v2 = vmov 2   ;;  %s281_s27 = sshra.s32 %s810_s22, 7  ;;  %v315_v3 = vld [vmem:[%s239_s17] sm:$0xf] }
  0x35   : > { %631 = vset.pattern.permute.xlu0 %v755_v1  ;;  %633 = vset.pattern.permute.xlu1 %v756_v2  ;;  %s901_s28 = sand.u32 127, %s810_s22  ;;  %s903_s24 = sshll.u32 %s281_s27, 7  ;;  %v381_v4 = vld [vmem:[%s973_s2] sm:$0xf]  ;;  %v757_v5 = vmov 1   ;;  %v758_v6 = vmov 3   ;;  %v316_v9 = vunpack.c.l.bf16 %v315_v3 }
  0x36   : > { %s542_s6 = sshll.u32 %s810_s22, 1  ;;  %635 = vset.pattern.permute.xlu2 %v755_v1  ;;  %s561_s7 = sadd.s32 384, %s903_s24 }
  0x37   : > { %p274_p1 = scmp.lt.s32.totalorder %s542_s6, 3  ;;  %s295_s8 = sadd.s32 %s561_s7, %s901_s28 }
  0x38   : > { %s909_s13 = sld [smem:[#allocation2 + %s810_s22]]  ;;  %s557_s14 = sadd.s32 128, %s903_s24 }
  0x39   : > { %s296_s12 = sld [smem:[#allocation2 + %s295_s8]]  ;;  %s994_s6 = smov (!%p274_p1, %s542_s6), 3 }
  0x3a   : > { %v324_v0 = vld [vmem:[%s986_s1] sm:$0xf]  ;;  %s287_s15 = sadd.s32 %s557_s14, %s901_s28  ;;  %s559_s23 = sadd.s32 256, %s903_s24 }
  0x3b   : > { %327 = vperm.xlu0 %631, %v324_v0   ;;  %354 = vperm.xlu1 %633, %v324_v0   ;;  %s543_s29 = sshll.u32 %s994_s6, 1  ;;  %s288_s26 = sld [smem:[#allocation2 + %s287_s15]] }
  0x3c   : > { %s277_s7 = scalar_lea.vmem %s974_s3, %s543_s29  ;;  %s291_s8 = sadd.s32 %s559_s23, %s901_s28 }
  0x3d   : > { %s292_s17 = sld [smem:[#allocation2 + %s291_s8]]  ;;  %v313_v7 = vld [vmem:[%s277_s7] sm:$0xf]  ;;  %s563_s6 = sadd.s32 512, %s903_s24 }
  0x3e   : > { %v317_v8 = vstv %s909_s13  ;;  %v314_v11 = vunpack.c.l.bf16 %v313_v7  ;;  %s299_s0 = sadd.s32 %s563_s6, %s901_s28  ;;  %s565_s1 = sadd.s32 640, %s903_s24 }
  0x3f   : > { %v382_v10 = vstv %s296_s12  ;;  %s303_s16 = sadd.s32 %s565_s1, %s901_s28  ;;  %s567_s14 = sadd.s32 768, %s903_s24 }
  0x40   : > { %v383_v12 = vmul.f32 %v382_v10, %v381_v4  ;;  %v318_v13 = vmul.f32 %v317_v8, %v314_v11  ;;  %s928_s15 = sadd.s32 %s567_s14, %s901_s28  ;;  %s569_s13 = sadd.s32 896, %s903_s24 }
  0x41   : > { %v319_v14 = vstv %s288_s26  ;;  %s932_s23 = sadd.s32 %s569_s13, %s901_s28  ;;  %s300_s12 = sld [smem:[#allocation2 + %s299_s0]] }
  0x42   : > { %386 = vperm.xlu2 %635, %v383_v12   ;;  %v320_v15 = vmul.f32 %v319_v14, %v316_v9  ;;  %s304_s29 = sld [smem:[#allocation2 + %s303_s16]]  ;;  %s552_s26 = sshll.u32 %s810_s22, 2 }
  0x43   : > { %632 = vset.pattern.permute.xlu0 %v757_v5  ;;  %634 = vset.pattern.permute.xlu1 %v758_v6  ;;  %v322_v16 = vstv %s292_s17  ;;  %s308_s28 = sld [smem:[#allocation2 + %s928_s15]]  ;;  %s432_s8 = scalar_lea.hbm %s976_s5, %s552_s26 }
  0x44   : > { %340 = vperm.xlu0 %632, %v324_v0   ;;  %368 = vperm.xlu1 %634, %v324_v0   ;;  %v321_v17 = vadd.f32 %v320_v15, %v318_v13  ;;  %s312_s24 = sld [smem:[#allocation2 + %s932_s23]]  ;;  %s987_s17 = sshll.u32 %s886_s11, 2 }
  0x45   : > { %s272_s6 = scalar_lea.vmem [#allocation7], %s987_s17  ;;  %s436_s1 = sshll.u32 %s432_s8, 4  ;;  %s437_s1 = int_to_ptr.hbm [resolvable:$true] %s436_s1 }
  0x46   : > { %v323_v18 = vadd.f32 %v322_v16, %v321_v17  ;;  %s434_s0 = sshll.u32 %s272_s6, 4  ;;  %s422_s22 = scalar_lea.sflag [#allocation4], %s886_s11  ;;  %s435_s0 = int_to_ptr.vmem [resolvable:$true] %s434_s0 }
  0x47   : > { %v391_v19 = vstv %s300_s12  ;;  %s696_s16 = sshra.s32 %s437_s1, 4  ;;  %s702_s23 = scalar_lea.hbm %s976_s5, 8  ;;  %s697_s16 = int_to_ptr.hbm [resolvable:$true] %s696_s16 }
  0x48   : > { %v392_v20 = vmul.f32 %v391_v19, %v316_v9  ;;  %v401_v21 = vstv %s304_s29  ;;  %v331_v27 = vperm.slane %v323_v18, 0  ;;  %v332_v28 = vperm.slane %v323_v18, 4  ;;  %s698_s14 = scalar_lea.hbm %s697_s16, 4  ;;  %p703_p10 = scmp.lt.s32.totalorder %s697_s16, %s976_s5 }
  0x49   : > { %v402_v22 = vmul.f32 %v401_v21, %v314_v11  ;;  %v343_v29 = vperm.slane %v323_v18, 1  ;;  %v344_v30 = vperm.slane %v323_v18, 5  ;;  %v357_v31 = vperm.slane %v323_v18, 2  ;;  %p699_p4 = scmp.ne.s32.totalorder %s697_s16, %s698_s14  ;;  %p704_p2 = scmp.lt.s32.totalorder %s702_s23, %s698_s14 }
  0x4a   : > { %394 = vst [vmem:[#allocation1] ss:$2 sm:$0xff] %v392_v20  ;;  %v358_v32 = vperm.slane %v323_v18, 6  ;;  %v371_v33 = vperm.slane %v323_v18, 3  ;;  %v372_v34 = vperm.slane %v323_v18, 7  ;;  %v335_v35 = vperm.slane %v331_v27, 0 }
  0x4b   : > { %v336_v36 = vperm.slane %v332_v28, 0  ;;  %v347_v37 = vperm.slane %v343_v29, 1  ;;  %v348_v38 = vperm.slane %v344_v30, 1  ;;  %v361_v39 = vperm.slane %v357_v31, 2  ;;  %p700_p8 = pnand %p699_p4, %p855_p3  ;;  %p705_p11 = por %p704_p2, %p703_p10 }
  0x4c   : > { %636 = vset.pattern.permute.xlu0 %v755_v1  ;;  %v362_v40 = vperm.slane %v358_v32, 2  ;;  %v375_v41 = vperm.slane %v371_v33, 3  ;;  %v376_v42 = vperm.slane %v372_v34, 3  ;;  %v411_v2 = vstv %s308_s28 }
  0x4d   : > { %v416_v7 = vstv %s312_s24  ;;  %p701_p9 = pneg %p700_p8 }
  0x4f   : > { %p706_p12 = pnand %p705_p11, %p701_p9 }
  0x51   : > { %v395_v23 = vld.sshfl [vmem:[#allocation1] sm:$0xff pattern:$0x75316420]  ;;  %v396_v24 = vld.sshfl [vmem:[#allocation1 + $0x8] sm:$0xff pattern:$0x75316420] }
  0x52   : > { %404 = vst [vmem:[#allocation1] ss:$2 sm:$0xff] %v402_v22 }
  0x59   : > { %v405_v62 = vld.sshfl [vmem:[#allocation1] sm:$0xff pattern:$0x75316420]  ;;  %v406_v63 = vld.sshfl [vmem:[#allocation1 + $0x8] sm:$0xff pattern:$0x75316420] }
  0x9c   : > { %v387_v57 = vpop.permute.xlu2 %386 }
  0xad   : > { %v328_v25 = vpop.permute.xlu0 %327  ;;  %v355_v26 = vpop.permute.xlu1 %354 }
  0xae   : > { %v337_v45 = vmul.f32 %v335_v35, %v328_v25  ;;  %v338_v46 = vmul.f32 %v336_v36, %v328_v25  ;;  %v363_v49 = vmul.f32 %v361_v39, %v355_v26  ;;  %v364_v50 = vmul.f32 %v362_v40, %v355_v26 }
  0xb6   : > { %v341_v43 = vpop.permute.xlu0 %340  ;;  %v369_v44 = vpop.permute.xlu1 %368 }
  0xb7   : > { %v349_v47 = vmul.f32 %v347_v37, %v341_v43  ;;  %v350_v48 = vmul.f32 %v348_v38, %v341_v43  ;;  %v377_v53 = vmul.f32 %v375_v41, %v369_v44  ;;  %v378_v54 = vmul.f32 %v376_v42, %v369_v44 }
  0xb9   : > { %v351_v51 = vadd.f32 %v349_v47, %v337_v45  ;;  %v352_v52 = vadd.f32 %v350_v48, %v338_v46 }
  0xbb   : > { %v365_v55 = vadd.f32 %v363_v49, %v351_v51  ;;  %v366_v56 = vadd.f32 %v364_v50, %v352_v52 }
  0xbd   : > { %v379_v58 = vadd.f32 %v377_v53, %v365_v55  ;;  %v380_v59 = vadd.f32 %v378_v54, %v366_v56 }
  0xbf   : > { %v389_v60 = vadd.f32 %v387_v57, %v379_v58  ;;  %v390_v61 = vadd.f32 %v387_v57, %v380_v59 }
  0xc1   : > { %v399_v0 = vsub.f32 %v389_v60, %v395_v23  ;;  %v400_v1 = vsub.f32 %v390_v61, %v396_v24 }
  0xc3   : > { %v409_v3 = vadd.f32 %v405_v62, %v399_v0  ;;  %v410_v4 = vadd.f32 %v406_v63, %v400_v1 }
  0xc5   : > { %v412_v5 = vsub.f32 %v409_v3, %v411_v2  ;;  %v413_v6 = vsub.f32 %v410_v4, %v411_v2 }
  0xc7   : > { %v414_v8 = vmul.f32 %v412_v5, %v412_v5  ;;  %v415_v9 = vmul.f32 %v413_v6, %v413_v6 }
  0xc9   : > { %v417_v10 = vmul.f32 %v416_v7, %v414_v8  ;;  %v418_v11 = vmul.f32 %v416_v7, %v415_v9 }
  0xcb   : > { %v419_v12 = vadd.f32 %v418_v11, %v417_v10 }
  0xcd   : > { %420 = vst [vmem:[%s272_s6] sm:$0xf] %v419_v12 }
  0xce   : > { %709 = shalt.err (!%p706_p12)
}
  0xcf   : > { %576 = dma.vmem_to_hbm [thread:$0]  (%p855_p3), %s435_s0, 64, %s437_s1, %s422_s22  }
  0xd0 PF: > { %s448_s11 = sand.u32 1, %s740_s18   ;;  %p988_p13 = scmp.ge.s32.totalorder %s752_s21, 2 }
  0xd1   : > { %s449_s28 = scalar_lea.sflag [#allocation4], %s448_s11 }
  0xd2   : > { %p587_p0 = pnand %p988_p13, %p824_p6 }
  0xd4   : > { %p588_p5 = pneg %p587_p0 }
  0xd6   : > { %735 = dma.done.wait (%p588_p5), %s449_s28, 64  }
  0xd7   : > { %737 = vsyncadd (%p588_p5), %s449_s28, 4294967232  ;;  %p19_p7 = scmp.ge.s32.totalorder %s840_s30, 4   ;;  %s989_s18 = smov %s744_s19 }
  0xd8   : > { %s990_s19 = smov %s748_s20  ;;  %s991_s20 = smov %s850_s9 }
  0xd9   : > { %s992_s21 = smov %s840_s30  ;;  %21 = sbr.rel (!%p19_p7) target bundleno = 9 (0x9), region = 93 }
  0xde   :  { %455 = vsyncpa [#allocation3], 1 }
  0xdf   :  { %457 = vsyncpa [#allocation3 + $0x1], 1 }
  0xe0   :  { %458 = vsyncpa [#allocation4], 1 }
  0xe1   :  { %460 = vsyncpa [#allocation4 + $0x1], 1 }
  0xe2   :  { %461 = vsyncpa [#allocation5], 1 }
  0xe3   :  { %463 = vsyncpa [#allocation5 + $0x1], 1 }

</bundles_post_ra>
